<compile_context>
chip_gen: v5e
topology: v5e:2x2
jax: 0.10.0
libtpu: 0.0.40
codegen_flags: <defaults>
</compile_context>

<pallas_src>
import functools

import jax
import jax.numpy as jnp
from jax.experimental import pallas as pl
from jax.experimental.pallas import tpu as pltpu


def _mlp_kernel(x_ref, w1_ref, b1_ref, w2_ref, b2_ref, o_ref):
    x = x_ref[...]        # (3, TILE_B)   batch on lanes
    w1 = w1_ref[...]      # (10, 3)       torch layout (out, in)
    b1 = b1_ref[...]      # (10, 1)
    w2 = w2_ref[...]      # (10, 1)       torch (1, 10) pre-transposed
    b2 = b2_ref[...]      # (1, 1)

    # Layer 1: hidden (10, TILE_B) = W1 @ x + b1, unrolled over K=3 on the VPU.
    h = (b1
         + w1[:, 0:1] * x[0:1, :]
         + w1[:, 1:2] * x[1:2, :]
         + w1[:, 2:3] * x[2:3, :])
    h = jnp.maximum(h, 0.0)                                    # ReLU

    # Layer 2: out (1, TILE_B) = w2 . h + b2 (sublane reduce on the XLU).
    o = b2 + jnp.sum(w2 * h, axis=0, keepdims=True)
    o_ref[...] = o.astype(o_ref.dtype)


@functools.partial(jax.jit, static_argnames=("tile_b",))
def mlp_forward(x, w1, b1, w2, b2, *, tile_b=512):
    """x: (B, 3) f32; w1: (10, 3); b1: (10,); w2: (1, 10); b2: (1,). Returns (B, 1)."""
    B = x.shape[0]
    d_in, d_hid, d_out = w1.shape[1], w1.shape[0], w2.shape[0]

    # Lane tile: multiple of 128, capped so tiny batches don't over-pad.
    b128 = ((B + 127) // 128) * 128
    tile_b = min(tile_b, b128)
    b_pad = pl.cdiv(B, tile_b) * tile_b

    # Lane-dense layouts (batch on last axis); zero-pad batch to the tile grid.
    x_t = jnp.pad(x.T.astype(jnp.float32), ((0, 0), (0, b_pad - B)))   # (3, b_pad)
    b1_c = b1.reshape(d_hid, 1).astype(jnp.float32)                    # (10, 1)
    w2_t = w2.T.astype(jnp.float32)                                    # (10, 1)
    b2_c = b2.reshape(d_out, 1).astype(jnp.float32)                    # (1, 1)
    w1_f = w1.astype(jnp.float32)                                      # (10, 3)

    const_spec = lambda shape: pl.BlockSpec(shape, lambda i: (0,) * len(shape))

    out_t = pl.pallas_call(
        _mlp_kernel,
        out_shape=jax.ShapeDtypeStruct((d_out, b_pad), jnp.float32),
        grid=(b_pad // tile_b,),
        in_specs=[
            pl.BlockSpec((d_in, tile_b), lambda i: (0, i)),   # x tile, pipelined
            const_spec((d_hid, d_in)),                        # w1: VMEM-resident
            const_spec((d_hid, 1)),                           # b1: VMEM-resident
            const_spec((d_hid, 1)),                           # w2^T: VMEM-resident
            const_spec((d_out, 1)),                           # b2: VMEM-resident
        ],
        out_specs=pl.BlockSpec((d_out, tile_b), lambda i: (0, i)),
        compiler_params=pltpu.CompilerParams(
            dimension_semantics=("parallel",),
        ),
    )(x_t, w1_f, b1_c, w2_t, b2_c)

    return out_t[:, :B].T   # (B, 1)


def mlp_reference(x, w1, b1, w2, b2):
    h = jnp.maximum(x @ w1.T + b1, 0.0)
    return h @ w2.T + b2


if __name__ == "__main__":
    key = jax.random.PRNGKey(0)
    k_x, k_w1, k_b1, k_w2, k_b2, k_x2 = jax.random.split(key, 6)

    D_IN, D_HID, D_OUT = 3, 10, 1

    # Deterministic synthetic parameters in torch nn.Linear layout (out, in).
    w1 = jax.random.normal(k_w1, (D_HID, D_IN), dtype=jnp.float32) * 0.5
    b1 = jax.random.normal(k_b1, (D_HID,), dtype=jnp.float32) * 0.1
    w2 = jax.random.normal(k_w2, (D_OUT, D_HID), dtype=jnp.float32) * 0.5
    b2 = jax.random.normal(k_b2, (D_OUT,), dtype=jnp.float32) * 0.1

    # Small-batch check (single tile, padded to 128 lanes).
    B = 8
    x = jax.random.normal(k_x, (B, D_IN), dtype=jnp.float32)
    out = jax.block_until_ready(mlp_forward(x, w1, b1, w2, b2))
    ref = mlp_reference(x, w1, b1, w2, b2)
    assert out.shape == (B, D_OUT)
    assert jnp.allclose(out, ref, atol=1e-5, rtol=1e-5), "mismatch vs reference (small batch)"

    # Multi-tile check (exercises the batch grid, padding, and grid-invariant weights).
    B2 = 1200
    x2 = jax.random.normal(k_x2, (B2, D_IN), dtype=jnp.float32)
    out2 = jax.block_until_ready(mlp_forward(x2, w1, b1, w2, b2))
    ref2 = mlp_reference(x2, w1, b1, w2, b2)
    assert out2.shape == (B2, D_OUT)
    assert jnp.allclose(out2, ref2, atol=1e-5, rtol=1e-5), "mismatch vs reference (multi tile)"

    print("KERNEL_OK")
</pallas_src>

<mosaic_0001>
module attributes {stable_mosaic.version = 11 : i64} {
  func.func @_mlp_kernel(%arg0: i32, %arg1: memref<3x128xf32, #tpu.memory_space<vmem>>, %arg2: memref<10x3xf32, #tpu.memory_space<vmem>>, %arg3: memref<10x1xf32, #tpu.memory_space<vmem>>, %arg4: memref<10x1xf32, #tpu.memory_space<vmem>>, %arg5: memref<1x1xf32, #tpu.memory_space<vmem>>, %arg6: memref<1x128xf32, #tpu.memory_space<vmem>>) attributes {dimension_semantics = [#tpu.dimension_semantics<parallel>], iteration_bounds = array<i64: 1>, scalar_prefetch = 0 : i64, scratch_operands = 0 : i64, tpu.core_type = #tpu.core_type<tc>, window_params = [{transform_indices = @transform_0, window_bounds = array<i64: 3, 128>}, {pipeline_mode = #tpu.pipeline_mode<synchronous>, transform_indices = @transform_1, window_bounds = array<i64: 10, 3>}, {pipeline_mode = #tpu.pipeline_mode<synchronous>, transform_indices = @transform_2, window_bounds = array<i64: 10, 1>}, {pipeline_mode = #tpu.pipeline_mode<synchronous>, transform_indices = @transform_3, window_bounds = array<i64: 10, 1>}, {pipeline_mode = #tpu.pipeline_mode<synchronous>, transform_indices = @transform_4, window_bounds = array<i64: 1, 1>}, {transform_indices = @transform_5, window_bounds = array<i64: 1, 128>}]} {
    %c0 = arith.constant 0 : index
    %c0_0 = arith.constant 0 : index
    %0 = vector.load %arg1[%c0, %c0_0] : memref<3x128xf32, #tpu.memory_space<vmem>>, vector<3x128xf32>
    %c0_1 = arith.constant 0 : index
    %c0_2 = arith.constant 0 : index
    %1 = vector.load %arg2[%c0_1, %c0_2] : memref<10x3xf32, #tpu.memory_space<vmem>>, vector<10x3xf32>
    %c0_3 = arith.constant 0 : index
    %c0_4 = arith.constant 0 : index
    %2 = vector.load %arg3[%c0_3, %c0_4] : memref<10x1xf32, #tpu.memory_space<vmem>>, vector<10x1xf32>
    %c0_5 = arith.constant 0 : index
    %c0_6 = arith.constant 0 : index
    %3 = vector.load %arg4[%c0_5, %c0_6] : memref<10x1xf32, #tpu.memory_space<vmem>>, vector<10x1xf32>
    %c0_7 = arith.constant 0 : index
    %c0_8 = arith.constant 0 : index
    %4 = vector.load %arg5[%c0_7, %c0_8] : memref<1x1xf32, #tpu.memory_space<vmem>>, vector<1x1xf32>
    %5 = vector.extract_strided_slice %1 {offsets = [0, 0], sizes = [10, 1], strides = [1, 1]} : vector<10x3xf32> to vector<10x1xf32>
    %6 = vector.extract_strided_slice %0 {offsets = [0, 0], sizes = [1, 128], strides = [1, 1]} : vector<3x128xf32> to vector<1x128xf32>
    %7 = vector.broadcast %5 : vector<10x1xf32> to vector<10x128xf32>
    %8 = vector.broadcast %6 : vector<1x128xf32> to vector<10x128xf32>
    %9 = arith.mulf %7, %8 : vector<10x128xf32>
    %10 = vector.broadcast %2 : vector<10x1xf32> to vector<10x128xf32>
    %11 = arith.addf %10, %9 : vector<10x128xf32>
    %12 = vector.extract_strided_slice %1 {offsets = [0, 1], sizes = [10, 1], strides = [1, 1]} : vector<10x3xf32> to vector<10x1xf32>
    %13 = vector.extract_strided_slice %0 {offsets = [1, 0], sizes = [1, 128], strides = [1, 1]} : vector<3x128xf32> to vector<1x128xf32>
    %14 = vector.broadcast %12 : vector<10x1xf32> to vector<10x128xf32>
    %15 = vector.broadcast %13 : vector<1x128xf32> to vector<10x128xf32>
    %16 = arith.mulf %14, %15 : vector<10x128xf32>
    %17 = arith.addf %11, %16 : vector<10x128xf32>
    %18 = vector.extract_strided_slice %1 {offsets = [0, 2], sizes = [10, 1], strides = [1, 1]} : vector<10x3xf32> to vector<10x1xf32>
    %19 = vector.extract_strided_slice %0 {offsets = [2, 0], sizes = [1, 128], strides = [1, 1]} : vector<3x128xf32> to vector<1x128xf32>
    %20 = vector.broadcast %18 : vector<10x1xf32> to vector<10x128xf32>
    %21 = vector.broadcast %19 : vector<1x128xf32> to vector<10x128xf32>
    %22 = arith.mulf %20, %21 : vector<10x128xf32>
    %23 = arith.addf %17, %22 : vector<10x128xf32>
    %cst = arith.constant 0.000000e+00 : f32
    %24 = vector.broadcast %cst : f32 to vector<10x128xf32>
    %25 = arith.maximumf %23, %24 : vector<10x128xf32>
    %26 = vector.broadcast %3 : vector<10x1xf32> to vector<10x128xf32>
    %27 = arith.mulf %26, %25 : vector<10x128xf32>
    %cst_9 = arith.constant dense<0.000000e+00> : vector<128xf32>
    %28 = vector.multi_reduction <add>, %27, %cst_9 [0] : vector<10x128xf32> to vector<128xf32>
    %29 = vector.shape_cast %28 : vector<128xf32> to vector<1x128xf32>
    %30 = vector.broadcast %4 : vector<1x1xf32> to vector<1x128xf32>
    %31 = arith.addf %30, %29 : vector<1x128xf32>
    %c0_10 = arith.constant 0 : index
    %c0_11 = arith.constant 0 : index
    %32 = vector.load %arg6[%c0_10, %c0_11] : memref<1x128xf32, #tpu.memory_space<vmem>>, vector<1x128xf32>
    tpu.vector_store %arg6[%c0_10, %c0_11], %31 {strides = array<i32>} : memref<1x128xf32, #tpu.memory_space<vmem>>, vector<1x128xf32>,
    return
  }
  func.func @transform_0(%arg0: i32) -> (i32, i32) {
    %c0_i32 = arith.constant 0 : i32
    %c0_i32_0 = arith.constant 0 : i32
    return %c0_i32, %arg0 : i32, i32
  }
  func.func @transform_1(%arg0: i32) -> (i32, i32) {
    %c0_i32 = arith.constant 0 : i32
    %c0_i32_0 = arith.constant 0 : i32
    %c0_i32_1 = arith.constant 0 : i32
    return %c0_i32, %c0_i32_0 : i32, i32
  }
  func.func @transform_2(%arg0: i32) -> (i32, i32) {
    %c0_i32 = arith.constant 0 : i32
    %c0_i32_0 = arith.constant 0 : i32
    %c0_i32_1 = arith.constant 0 : i32
    return %c0_i32, %c0_i32_0 : i32, i32
  }
  func.func @transform_3(%arg0: i32) -> (i32, i32) {
    %c0_i32 = arith.constant 0 : i32
    %c0_i32_0 = arith.constant 0 : i32
    %c0_i32_1 = arith.constant 0 : i32
    return %c0_i32, %c0_i32_0 : i32, i32
  }
  func.func @transform_4(%arg0: i32) -> (i32, i32) {
    %c0_i32 = arith.constant 0 : i32
    %c0_i32_0 = arith.constant 0 : i32
    %c0_i32_1 = arith.constant 0 : i32
    return %c0_i32, %c0_i32_0 : i32, i32
  }
  func.func @transform_5(%arg0: i32) -> (i32, i32) {
    %c0_i32 = arith.constant 0 : i32
    %c0_i32_0 = arith.constant 0 : i32
    return %c0_i32, %arg0 : i32, i32
  }
}

</mosaic_0001>

<bundles_post_ra>
// kernel: mlp_forward.1
= control target key start
LH: loop header
LB: loop body
LE: loop exit
PB: predicated region body
PF: predicated region fallthrough
CT: control target
= control target key end

     0   :  { %v129_v0 = vmov 0   ;;  %v130_v6 = vmov 1   ;;  %v131_v7 = vmov 2   ;;  %vm95_vm0 = vcmask 1041408   ;;  %s189_s2 = inlined_call_operand.vmem [shape: f32[10,1], index: 2, kind: input, shape index: {}]   ;;  %s190_s1 = inlined_call_operand.vmem [shape: f32[10,3], index: 1, kind: input, shape index: {}]   ;;  %s191_s4 = inlined_call_operand.<no memory space> [shape: f32[1,1], index: 4, kind: input, shape index: {}]   ;;  %s192_s3 = inlined_call_operand.vmem [shape: f32[10,1], index: 3, kind: input, shape index: {}]   ;;  %s193_s0 = inlined_call_operand.vmem [shape: f32[3,128], index: 0, kind: input, shape index: {}]   ;;  %s194_s5 = inlined_call_operand.vmem [shape: f32[1,128], index: 5, kind: output, shape index: {}]  }
   0x1   :  { %120 = vset.pattern.permute.xlu1 %v129_v0  ;;  %119 = vset.pattern.permute.xlu0 %v129_v0  ;;  %v26_v1 = vld [vmem:[%s189_s2 + $0x8] sm:$0x3]  ;;  %v10_v3 = vstv %s191_s4  ;;  %v25_v4 = vld [vmem:[%s189_s2] sm:$0xff] }
   0x2   :  { %v24_v2 = vld [vmem:[%s190_s1 + $0x8] sm:$0x3]  ;;  %50 = vperm.xlu1 %120, %v26_v1   ;;  %11 = vst [vmem:[#allocation2] sm:$0x1] %v10_v3  ;;  %122 = vset.pattern.permute.xlu2 %v129_v0  ;;  %v23_v5 = vld [vmem:[%s190_s1] sm:$0xff] }
   0x3   :  { %37 = vperm.xlu0 %119, %v24_v2   ;;  %45 = vperm.xlu2 %122, %v25_v4   ;;  %v28_v8 = vld [vmem:[%s192_s3 + $0x8] sm:$0x3]  ;;  %v27_v9 = vld [vmem:[%s192_s3] sm:$0xff] }
   0x4   :  { %v22_v14 = vld [vmem:[%s193_s0] sm:$0x7] }
   0x5   :  { %v40_v15 = vperm.slane %v22_v14, 0  ;;  %v63_v18 = vperm.slane %v22_v14, 1  ;;  %v76_v23 = vperm.slane %v22_v14, 2 }
   0x9   :  { %v29_v10 = vld [vmem:[#allocation2] sm:$0x1] }
   0xa   :  { %121 = vset.pattern.permute.xlu1 %v130_v6 }
   0xb   :  { %32 = vperm.xlu0 %119, %v23_v5   ;;  %60 = vperm.xlu1 %121, %v24_v2  }
   0xc   :  { %123 = vset.pattern.permute.xlu2 %v130_v6 }
   0xd   :  { %56 = vperm.xlu2 %123, %v23_v5  }
  0x13   :  { %124 = vset.pattern.permute.xlu0 %v131_v7  ;;  %125 = vset.pattern.permute.xlu1 %v131_v7 }
  0x14   :  { %73 = vperm.xlu0 %124, %v24_v2   ;;  %69 = vperm.xlu1 %125, %v23_v5  }
  0x15   :  { %126 = vset.pattern.permute.xlu2 %v129_v0 }
  0x16   :  { %90 = vperm.xlu2 %126, %v28_v8  }
  0x1c   :  { %128 = vset.pattern.permute.xlu0 %v129_v0  ;;  %127 = vset.pattern.permute.xlu1 %v129_v0 }
  0x1d   :  { %85 = vperm.xlu1 %127, %v27_v9  }
  0x1e   :  { %106 = vperm.xlu2 %126, %v29_v10  }
  0x5d   :  { %v46_v13 = vpop.permute.xlu2 %45 }
  0x67   :  { %v57_v21 = vpop.permute.xlu2 %56 }
  0x68   :  { %v64_v26 = vmul.f32 %v63_v18, %v57_v21 }
  0x70   :  { %v91_v36 = vpop.permute.xlu2 %90 }
  0x74   :  { %v51_v11 = vpop.permute.xlu1 %50 }
  0x75   :  { %v38_v12 = vpop.permute.xlu0 %37 }
  0x76   :  { %v42_v19 = vmul.f32 %v40_v15, %v38_v12 }
  0x78   :  { %v54_v24 = vadd.f32 %v51_v11, %v42_v19  ;;  %v107_v47 = vpop.permute.xlu2 %106 }
  0x79   :  { %v109_v49 = vperm.slane %v107_v47, 0 }
  0x7d   :  { %v33_v16 = vpop.permute.xlu0 %32  ;;  %v61_v17 = vpop.permute.xlu1 %60 }
  0x7e   :  { %v41_v20 = vmul.f32 %v40_v15, %v33_v16  ;;  %v65_v22 = vmul.f32 %v63_v18, %v61_v17 }
  0x80   :  { %v53_v25 = vadd.f32 %v46_v13, %v41_v20  ;;  %v67_v28 = vadd.f32 %v65_v22, %v54_v24 }
  0x82   :  { %v66_v32 = vadd.f32 %v64_v26, %v53_v25 }
  0x86   :  { %v74_v27 = vpop.permute.xlu0 %73  ;;  %v70_v30 = vpop.permute.xlu1 %69 }
  0x87   :  { %v78_v29 = vmul.f32 %v76_v23, %v74_v27  ;;  %v77_v31 = vmul.f32 %v76_v23, %v70_v30 }
  0x89   :  { %v80_v33 = vadd.f32 %v78_v29, %v67_v28  ;;  %v79_v34 = vadd.f32 %v77_v31, %v66_v32 }
  0x8b   :  { %v82_v35 = vmax.f32 %v80_v33, 0.0  ;;  %v81_v38 = vmax.f32 %v79_v34, 0.0 }
  0x8d   :  { %v94_v37 = vmul.f32 %v91_v36, %v82_v35 }
  0x8f   :  { %v86_v39 = vpop.permute.xlu1 %85  ;;  %v96_v41 = vsel %vm95_vm0, %v94_v37, 0.0 }
  0x90   :  { %v93_v40 = vmul.f32 %v86_v39, %v81_v38 }
  0x92   :  { %v97_v42 = vadd.f32 %v96_v41, %v93_v40 }
  0x94   :  { %v98_v43 = vrot.slane %v97_v42, 4 }
  0x96   :  { %v99_v44 = vadd.f32 %v98_v43, %v97_v42 }
  0x98   :  { %v100_v45 = vrot.slane %v99_v44, 2 }
  0x9a   :  { %v101_v46 = vadd.f32 %v100_v45, %v99_v44 }
  0x9c   :  { %v102_v48 = vrot.slane %v101_v46, 1 }
  0x9e   :  { %v103_v50 = vadd.f32 %v102_v48, %v101_v46 }
  0xa0   :  { %v110_v51 = vadd.f32 %v109_v49, %v103_v50 }
  0xa2   :  { %111 = vst [vmem:[%s194_s5] sm:$0x1] %v110_v51 }

</bundles_post_ra>
